<compile_context>
chip_gen: v6e
topology: v6e:2x2x1
jax: 0.10.0
libtpu: 0.0.40
codegen_flags: <defaults>
</compile_context>

<pallas_src>
import math
import functools

import jax
import jax.numpy as jnp
from jax.experimental import pallas as pl
from jax.experimental.pallas import tpu as pltpu


# ------------------------------ fused kernel --------------------------------

def _fused_gnn_kernel(adj_ref, h0_hbm_ref, w_ref, b_ref, out_ref,
                      h_ref, init_sem, *, jk, num_nodes, tile_n, adj_resident):
    """Grid = (num_layers, num_row_tiles); the layer axis is OUTER (sequential).

    h_ref is a (2*N, D) VMEM ping-pong buffer in the matmul dtype: layer l
    reads rows [(l % 2) * N, (l % 2) * N + N) and writes its tile into the
    other half. adj_ref is either the full (N, N) VMEM-resident adjacency
    (adj_resident=True) or a streamed (tile_n, N) row slab.
    """
    l = pl.program_id(0)            # layer index (outer, sequential)
    j = pl.program_id(1)            # row-tile index (inner)
    num_layers = pl.num_programs(0)

    read_base = pl.multiple_of((l % 2) * num_nodes, num_nodes)
    write_base = num_nodes - read_base
    row = pl.multiple_of(j * tile_n, tile_n)

    # One-shot DMA of h0 = features + prompt (pre-added and pre-cast to the
    # matmul dtype in the wrapper, kept in HBM) into the VMEM H buffer.
    @pl.when((l == 0) & (j == 0))
    def _init():
        cp = pltpu.make_async_copy(h0_hbm_ref,
                                   h_ref.at[pl.ds(0, num_nodes)],
                                   init_sem)
        cp.start()
        cp.wait()

    # ---- message passing for this row tile: relu((A[j] @ H) @ W[l] + b[l]) ----
    if adj_resident:
        a = adj_ref[pl.ds(row, tile_n), :]       # slice the resident adjacency
    else:
        a = adj_ref[...]                         # streamed (tile_n, N) slab
    h_prev = h_ref[pl.ds(read_base, num_nodes), :]
    agg = jnp.dot(a, h_prev, preferred_element_type=jnp.float32)   # f32 acc

    w = w_ref[0]
    agg_in = agg if w.dtype == jnp.float32 else agg.astype(w.dtype)
    z = jnp.dot(agg_in, w, preferred_element_type=jnp.float32) + b_ref[0]
    h_new = jnp.maximum(z, 0.0)                  # f32 epilogue (v5e VPU: no bf16)

    # Keep H resident in VMEM for the next layer (ping-pong, matmul dtype).
    h_ref[pl.ds(write_base + row, tile_n), :] = h_new.astype(h_ref.dtype)

    # ---- fused JK aggregation (f32) ----
    if jk == "concat":
        # each (l, j) step owns its own lane-dense (tile_n, D) block of [N, L*D]
        out_ref[...] = h_new.astype(out_ref.dtype)
    elif jk == "last":
        @pl.when(l == num_layers - 1)            # single gated store per tile
        def _():
            out_ref[pl.ds(row, tile_n), :] = h_new.astype(out_ref.dtype)
    elif jk == "sum":
        @pl.when(l == 0)
        def _():
            out_ref[pl.ds(row, tile_n), :] = h_new
        @pl.when(l > 0)
        def _():
            out_ref[pl.ds(row, tile_n), :] = out_ref[pl.ds(row, tile_n), :] + h_new
    else:  # "max"
        @pl.when(l == 0)
        def _():
            out_ref[pl.ds(row, tile_n), :] = h_new
        @pl.when(l > 0)
        def _():
            out_ref[pl.ds(row, tile_n), :] = jnp.maximum(
                out_ref[pl.ds(row, tile_n), :], h_new)


def gnn_forward(adj, features, prompt, weights, biases, *, jk="last",
                tile_n=128, matmul_dtype=jnp.bfloat16,
                adj_vmem_budget_bytes=16 << 20):
    """Fused forward. weights: [L, D, D], biases: [L, 1, D]."""
    N, D = features.shape
    L = weights.shape[0]
    assert adj.shape == (N, N)
    assert jk in ("last", "concat", "sum", "max")

    compute_dtype = jnp.float32 if matmul_dtype is None else matmul_dtype
    itm = jnp.dtype(compute_dtype).itemsize

    # GPF prompt add fused into the wrapper; the result (in the matmul dtype)
    # stays in HBM and is DMA'd into the VMEM H buffer once at step (0, 0).
    h0 = features if prompt is None else features + prompt
    h0 = h0.astype(compute_dtype)

    # Pre-cast the adjacency / weights once (removes per-step in-kernel casts
    # and halves the adjacency HBM bytes on the bf16 path).
    adj_c = adj.astype(compute_dtype)
    w_c = weights.astype(compute_dtype)
    b_f32 = biases.astype(jnp.float32)

    tile_n = min(tile_n, N)
    assert N % tile_n == 0, "num_nodes must be a multiple of tile_n"
    num_row_tiles = N // tile_n

    # VMEM-resident adjacency when it fits the budget; otherwise stream slabs.
    adj_resident = (N * N * itm) <= adj_vmem_budget_bytes
    if adj_resident:
        adj_spec = pl.BlockSpec((N, N), lambda l, j: (0, 0))
    else:
        adj_spec = pl.BlockSpec((tile_n, N), lambda l, j: (j, 0))

    if jk == "concat":
        out_shape = jax.ShapeDtypeStruct((N, L * D), jnp.float32)
        out_spec = pl.BlockSpec((tile_n, D), lambda l, j: (j, l))
    else:
        # Output stays resident in VMEM for the whole grid (single writeback);
        # for sum/max it doubles as the JK accumulator.
        out_shape = jax.ShapeDtypeStruct((N, D), jnp.float32)
        out_spec = pl.BlockSpec((N, D), lambda l, j: (0, 0))

    # Explicit scoped-VMEM budget: H ping-pong + adjacency + W/b double buffers
    # + resident output, with generous headroom.
    est = (2 * N * D * itm
           + (2 * N * N * itm if adj_resident else 2 * tile_n * N * itm)
           + 2 * D * D * itm
           + 2 * D * 4
           + (2 * tile_n * D * 4 if jk == "concat" else 2 * N * D * 4))
    vmem_limit = int(min(96 << 20, max(32 << 20, 2 * est + (8 << 20))))

    kernel = functools.partial(
        _fused_gnn_kernel, jk=jk, num_nodes=N, tile_n=tile_n,
        adj_resident=adj_resident)

    return pl.pallas_call(
        kernel,
        out_shape=out_shape,
        grid=(L, num_row_tiles),                   # layer axis OUTER, tiles inner
        in_specs=[
            adj_spec,                                        # adjacency
            pl.BlockSpec(memory_space=pl.ANY),               # h0 in HBM (DMA once)
            pl.BlockSpec((1, D, D), lambda l, j: (l, 0, 0)),  # W[l]
            pl.BlockSpec((1, 1, D), lambda l, j: (l, 0, 0)),  # b[l]
        ],
        out_specs=out_spec,
        scratch_shapes=[
            pltpu.VMEM((2 * N, D), compute_dtype),           # H ping-pong
            pltpu.SemaphoreType.DMA(()),                     # h0 init DMA sem
        ],
        compiler_params=pltpu.CompilerParams(
            # Both axes carry state (VMEM H scratch / resident output block),
            # so they must be sequential on one TensorCore.
            dimension_semantics=("arbitrary", "arbitrary"),
            vmem_limit_bytes=vmem_limit),
    )(adj_c, h0, w_c, b_f32)


# ------------------------------ GNN wrapper ---------------------------------

class GNNPallas:
    """Pallas port of GNN(pre_model, JK, drop_ratio).

    The DGL `pre_model` (sparse bipartite blocks) is synthesized as `num_layer`
    dense message-passing layers h' = relu((A @ h) @ W + b) over a
    row-normalized dense adjacency; their per-layer hidden states form `h_list`
    for the JK aggregation.
    """

    def __init__(self, num_layer=3, emb_dim=128, JK="last", drop_ratio=0.0,
                 key=jax.random.PRNGKey(42)):
        assert JK in ("last", "concat", "max", "sum")
        self.JK = JK
        # TODO(synk): drop_ratio is ignored (dropout is the identity at the
        # reference default of 0.0).
        self.drop_ratio = drop_ratio
        keys = jax.random.split(key, num_layer)
        scale = 2.0 / math.sqrt(emb_dim)
        self.weights = jnp.stack([
            jax.random.uniform(k, (emb_dim, emb_dim), jnp.float32, -scale, scale)
            for k in keys])                                    # [L, D, D]
        self.biases = jnp.stack([
            0.01 * jnp.ones((1, emb_dim), jnp.float32)
            for _ in range(num_layer)])                        # [L, 1, D]

    def __call__(self, adj, features, prompt=None, *, tile_n=128,
                 matmul_dtype=jnp.bfloat16, adj_vmem_budget_bytes=16 << 20):
        # TODO(synk): DGL sparse blocks / bipartite message passing have no
        # clean Pallas equivalent; dense normalized adjacency matmul is used.
        return gnn_forward(adj, features, prompt, self.weights, self.biases,
                           jk=self.JK, tile_n=tile_n, matmul_dtype=matmul_dtype,
                           adj_vmem_budget_bytes=adj_vmem_budget_bytes)


# ------------------------------ reference -----------------------------------

def reference(adj, features, prompt, weights, biases, jk, matmul_dtype=None):
    h = features + prompt if prompt is not None else features
    h_list = []
    for l in range(weights.shape[0]):
        a, hp, w = adj, h, weights[l]
        if matmul_dtype is not None:
            a = a.astype(matmul_dtype)
            hp = hp.astype(matmul_dtype)
        agg = jnp.dot(a, hp, preferred_element_type=jnp.float32)
        if matmul_dtype is not None:
            agg = agg.astype(matmul_dtype)
            w = w.astype(matmul_dtype)
        h = jnp.maximum(jnp.dot(agg, w, preferred_element_type=jnp.float32)
                        + biases[l], 0.0)
        h_list.append(h)
    if jk == "last":
        return h_list[-1]
    if jk == "concat":
        return jnp.concatenate(h_list, axis=1)
    if jk == "max":
        return jnp.max(jnp.stack(h_list, 0), axis=0)
    if jk == "sum":
        return jnp.sum(jnp.stack(h_list, 0), axis=0)
    raise ValueError(jk)


# -------------------------------- main ---------------------------------------

if __name__ == "__main__":
    key = jax.random.PRNGKey(0)
    k_adj, k_feat, k_prompt = jax.random.split(key, 3)

    # nodes, emb_dim, layers: 128-row / 128-lane tiles (MXU-sized, lane-dense).
    N, D, L = 256, 128, 3
    tile_n = 128

    # random graph with self-loops, row-normalized dense adjacency
    adj_raw = (jax.random.uniform(k_adj, (N, N)) > 0.95).astype(jnp.float32)
    adj_raw = adj_raw + jnp.eye(N, dtype=jnp.float32)
    adj = adj_raw / jnp.sum(adj_raw, axis=1, keepdims=True)

    features = jax.random.normal(k_feat, (N, D), jnp.float32)
    prompt = jax.random.normal(k_prompt, (1, D), jnp.float32)  # GPF global prompt

    # bf16 MXU fast path (default): all JK modes, VMEM-resident adjacency,
    # checked against a reference applying the same bf16 rounding.
    for jk_mode in ("last", "sum", "max", "concat"):
        model = GNNPallas(num_layer=L, emb_dim=D, JK=jk_mode)
        out = jax.block_until_ready(model(adj, features, prompt, tile_n=tile_n))
        ref = reference(adj, features, prompt, model.weights, model.biases,
                        jk_mode, matmul_dtype=jnp.bfloat16)
        assert out.shape == ref.shape, (jk_mode, out.shape, ref.shape)
        assert jnp.allclose(out, ref, atol=1e-3, rtol=1e-2), jk_mode

    # f32 path (matmul_dtype=None), tight tolerance.
    for jk_mode in ("last", "sum"):
        model = GNNPallas(num_layer=L, emb_dim=D, JK=jk_mode)
        out = jax.block_until_ready(
            model(adj, features, prompt, tile_n=tile_n, matmul_dtype=None))
        ref = reference(adj, features, prompt, model.weights, model.biases, jk_mode)
        assert out.shape == ref.shape
        assert jnp.allclose(out, ref, atol=1e-4, rtol=1e-3), ("f32", jk_mode)

    # Streamed-adjacency fallback path (force budget to 0) + larger row tile.
    model = GNNPallas(num_layer=L, emb_dim=D, JK="last")
    out = jax.block_until_ready(
        model(adj, features, prompt, tile_n=256, adj_vmem_budget_bytes=0))
    ref = reference(adj, features, prompt, model.weights, model.biases, "last",
                    matmul_dtype=jnp.bfloat16)
    assert out.shape == ref.shape
    assert jnp.allclose(out, ref, atol=1e-3, rtol=1e-2), "streamed adj"

    print("KERNEL_OK")
</pallas_src>

<mosaic_0001>
module attributes {stable_mosaic.version = 11 : i64} {
  func.func @_fused_gnn_kernel(%arg0: i32, %arg1: i32, %arg2: memref<256x256xbf16, #tpu.memory_space<vmem>>, %arg3: memref<256x128xbf16, #tpu.memory_space<any>>, %arg4: memref<1x128x128xbf16, #tpu.memory_space<vmem>>, %arg5: memref<1x1x128xf32, #tpu.memory_space<vmem>>, %arg6: memref<256x128xf32, #tpu.memory_space<vmem>>, %arg7: memref<512x128xbf16, #tpu.memory_space<vmem>>, %arg8: memref<!tpu.dma_semaphore, #tpu.memory_space<semaphore_mem>>) attributes {dimension_semantics = [#tpu.dimension_semantics<arbitrary>, #tpu.dimension_semantics<arbitrary>], iteration_bounds = array<i64: 3, 2>, scalar_prefetch = 0 : i64, scratch_operands = 2 : i64, tpu.core_type = #tpu.core_type<tc>, window_params = [{pipeline_mode = #tpu.pipeline_mode<synchronous>, transform_indices = @transform_0, window_bounds = array<i64: 256, 256>}, {}, {transform_indices = @transform_2, window_bounds = array<i64: 1, 128, 128>}, {transform_indices = @transform_3, window_bounds = array<i64: 1, 1, 128>}, {pipeline_mode = #tpu.pipeline_mode<synchronous>, transform_indices = @transform_4, window_bounds = array<i64: 256, 128>}]} {
    %c2_i32 = arith.constant 2 : i32
    %c0_i32 = arith.constant 0 : i32
    %0 = arith.cmpi eq, %c2_i32, %c0_i32 : i32
    %c1_i32 = arith.constant 1 : i32
    %1 = arith.select %0, %c1_i32, %c2_i32 : i32
    %2 = arith.remsi %arg0, %1 : i32
    %c0_i32_0 = arith.constant 0 : i32
    %3 = arith.cmpi ne, %2, %c0_i32_0 : i32
    %c0_i32_1 = arith.constant 0 : i32
    %4 = arith.cmpi slt, %2, %c0_i32_1 : i32
    %c0_i32_2 = arith.constant 0 : i32
    %5 = arith.cmpi slt, %1, %c0_i32_2 : i32
    %6 = arith.xori %4, %5 : i1
    %7 = arith.andi %6, %3 : i1
    %8 = arith.addi %2, %1 : i32
    %9 = arith.select %7, %8, %2 : i32
    %c256_i32 = arith.constant 256 : i32
    %10 = arith.muli %9, %c256_i32 : i32
    %11 = tpu.assume_multiple %10, 256 : i32
    %c256_i32_3 = arith.constant 256 : i32
    %12 = arith.subi %c256_i32_3, %11 : i32
    %c128_i32 = arith.constant 128 : i32
    %13 = arith.muli %arg1, %c128_i32 : i32
    %14 = tpu.assume_multiple %13, 128 : i32
    %c0_i32_4 = arith.constant 0 : i32
    %15 = arith.cmpi eq, %arg0, %c0_i32_4 : i32
    %c0_i32_5 = arith.constant 0 : i32
    %16 = arith.cmpi eq, %arg1, %c0_i32_5 : i32
    %17 = arith.andi %15, %16 : i1
    %18 = arith.extui %17 : i1 to i32
    %c0_i32_6 = arith.constant 0 : i32
    %19 = arith.cmpi ne, %18, %c0_i32_6 : i32
    scf.if %19 {
      %c0_i32_19 = arith.constant 0 : i32
      %c0_i32_20 = arith.constant 0 : i32
      %42 = tpu.memref_slice %arg7[%c0_i32_19, %c0_i32_20] : memref<512x128xbf16, #tpu.memory_space<vmem>> -> memref<256x128xbf16, #tpu.memory_space<vmem>>
      tpu.enqueue_dma source(%arg3 : memref<256x128xbf16, #tpu.memory_space<any>>) target(%42 : memref<256x128xbf16, #tpu.memory_space<vmem>>) target_semaphore(%arg8 : memref<!tpu.dma_semaphore, #tpu.memory_space<semaphore_mem>>)
      %c0_i32_21 = arith.constant 0 : i32
      %c0_i32_22 = arith.constant 0 : i32
      %43 = tpu.memref_slice %arg7[%c0_i32_21, %c0_i32_22] : memref<512x128xbf16, #tpu.memory_space<vmem>> -> memref<256x128xbf16, #tpu.memory_space<vmem>>
      tpu.wait_dma2 semaphore(%arg8 : memref<!tpu.dma_semaphore, #tpu.memory_space<semaphore_mem>>) src(%arg3 : memref<256x128xbf16, #tpu.memory_space<any>>) dst(%43 : memref<256x128xbf16, #tpu.memory_space<vmem>>)
    } else {
    }
    %20 = arith.index_cast %14 : i32 to index
    %c0 = arith.constant 0 : index
    %21 = vector.load %arg2[%20, %c0] : memref<256x256xbf16, #tpu.memory_space<vmem>>, vector<128x256xbf16>
    %22 = arith.index_cast %11 : i32 to index
    %c0_7 = arith.constant 0 : index
    %23 = vector.load %arg7[%22, %c0_7] : memref<512x128xbf16, #tpu.memory_space<vmem>>, vector<256x128xbf16>
    %cst = arith.constant dense<0.000000e+00> : vector<128x128xf32>
    %24 = tpu.matmul %21, %23, %cst {dimension_numbers = #tpu.dot_dimension_numbers<[1], [0], [0], [1], [0, 0, 1, 1], [], []>} : vector<128x256xbf16>, vector<256x128xbf16>, vector<128x128xf32> -> vector<128x128xf32>
    %c0_8 = arith.constant 0 : index
    %c0_9 = arith.constant 0 : index
    %c0_10 = arith.constant 0 : index
    %25 = vector.load %arg4[%c0_8, %c0_9, %c0_10] : memref<1x128x128xbf16, #tpu.memory_space<vmem>>, vector<1x128x128xbf16>
    %26 = vector.shape_cast %25 : vector<1x128x128xbf16> to vector<128x128xbf16>
    %27 = arith.truncf %24 : vector<128x128xf32> to vector<128x128xbf16>
    %cst_11 = arith.constant dense<0.000000e+00> : vector<128x128xf32>
    %28 = tpu.matmul %27, %26, %cst_11 {dimension_numbers = #tpu.dot_dimension_numbers<[1], [0], [0], [1], [0, 0, 1, 1], [], []>} : vector<128x128xbf16>, vector<128x128xbf16>, vector<128x128xf32> -> vector<128x128xf32>
    %c0_12 = arith.constant 0 : index
    %c0_13 = arith.constant 0 : index
    %c0_14 = arith.constant 0 : index
    %29 = vector.load %arg5[%c0_12, %c0_13, %c0_14] : memref<1x1x128xf32, #tpu.memory_space<vmem>>, vector<1x1x128xf32>
    %30 = vector.shape_cast %29 : vector<1x1x128xf32> to vector<1x128xf32>
    %31 = vector.broadcast %30 : vector<1x128xf32> to vector<128x128xf32>
    %32 = arith.addf %28, %31 : vector<128x128xf32>
    %cst_15 = arith.constant 0.000000e+00 : f32
    %33 = vector.broadcast %cst_15 : f32 to vector<128x128xf32>
    %34 = arith.maximumf %32, %33 : vector<128x128xf32>
    %35 = arith.truncf %34 : vector<128x128xf32> to vector<128x128xbf16>
    %36 = arith.addi %12, %14 : i32
    %37 = arith.index_cast %36 : i32 to index
    %c0_16 = arith.constant 0 : index
    %38 = vector.load %arg7[%37, %c0_16] : memref<512x128xbf16, #tpu.memory_space<vmem>>, vector<128x128xbf16>
    tpu.vector_store %arg7[%37, %c0_16], %35 {strides = array<i32>} : memref<512x128xbf16, #tpu.memory_space<vmem>>, vector<128x128xbf16>,
    %c2_i32_17 = arith.constant 2 : i32
    %39 = arith.cmpi eq, %arg0, %c2_i32_17 : i32
    %40 = arith.extui %39 : i1 to i32
    %c0_i32_18 = arith.constant 0 : i32
    %41 = arith.cmpi ne, %40, %c0_i32_18 : i32
    scf.if %41 {
      %42 = arith.index_cast %14 : i32 to index
      %c0_19 = arith.constant 0 : index
      %43 = vector.load %arg6[%42, %c0_19] : memref<256x128xf32, #tpu.memory_space<vmem>>, vector<128x128xf32>
      tpu.vector_store %arg6[%42, %c0_19], %34 {strides = array<i32>} : memref<256x128xf32, #tpu.memory_space<vmem>>, vector<128x128xf32>,
    } else {
    }
    return
  }
  func.func @transform_0(%arg0: i32, %arg1: i32) -> (i32, i32) {
    %c0_i32 = arith.constant 0 : i32
    %c0_i32_0 = arith.constant 0 : i32
    %c0_i32_1 = arith.constant 0 : i32
    return %c0_i32, %c0_i32_0 : i32, i32
  }
  func.func @transform_2(%arg0: i32, %arg1: i32) -> (i32, i32, i32) {
    %c0_i32 = arith.constant 0 : i32
    %c0_i32_0 = arith.constant 0 : i32
    %c0_i32_1 = arith.constant 0 : i32
    return %arg0, %c0_i32, %c0_i32_0 : i32, i32, i32
  }
  func.func @transform_3(%arg0: i32, %arg1: i32) -> (i32, i32, i32) {
    %c0_i32 = arith.constant 0 : i32
    %c0_i32_0 = arith.constant 0 : i32
    %c0_i32_1 = arith.constant 0 : i32
    return %arg0, %c0_i32, %c0_i32_0 : i32, i32, i32
  }
  func.func @transform_4(%arg0: i32, %arg1: i32) -> (i32, i32) {
    %c0_i32 = arith.constant 0 : i32
    %c0_i32_0 = arith.constant 0 : i32
    %c0_i32_1 = arith.constant 0 : i32
    return %c0_i32, %c0_i32_0 : i32, i32
  }
}

</mosaic_0001>

<bundles_post_ra>
// kernel: tpu_custom_call.1
= control target key start
LH: loop header
LB: loop body
LE: loop exit
PB: predicated region body
PF: predicated region fallthrough
CT: control target
= control target key end

     0   :  { %9 = vsyncpa [#allocation5], 0  ;;  %s1875_s0 = inlined_call_operand.hbm [shape: bf16[256,256], index: 0, kind: input, shape index: {}]   ;;  %s1876_s1 = inlined_call_operand.hbm [shape: bf16[256,128], index: 1, kind: input, shape index: {}]   ;;  %s1877_s2 = inlined_call_operand.hbm [shape: bf16[3,128,128], index: 2, kind: input, shape index: {}]   ;;  %s1878_s3 = inlined_call_operand.vmem [shape: f32[3,1,128], index: 3, kind: input, shape index: {}]   ;;  %s1879_s4 = inlined_call_operand.hbm [shape: f32[256,128], index: 4, kind: output, shape index: {}]  }
   0x1   :  { %10 = vsyncpa [#allocation8], 0 }
   0x2   :  { %12 = vsyncpa [#allocation8 + $0x1], 0 }
   0x3   :  { %13 = vsyncpa [#allocation6], 0  ;;  %s1615_s15 = smov 0   ;;  %s1617_s16 = smov 0  }
   0x4   :  { %s1619_s17 = smov 0   ;;  %s1621_s18 = smov 0  }
   0x5   :  { %s1623_s19 = smov 0   ;;  %s1625_s20 = smov 0  }
   0x6   :  { %s1627_s21 = smov 0   ;;  %s1629_s22 = smov 0  }
   0x7 LB: > { %s1880_s23 = sadd.s32 4294967295, %s1578_s22   ;;  %p72_p0 = scmp.ne.s32.totalorder %s1554_s16, %s1550_s15  ;;  %s1578_s22 = sphi %s1629_s22, %s19_s22   ;;  %s1574_s21 = sphi %s1627_s21, %s1894_s21   ;;  %s1570_s20 = sphi %s1625_s20, %s1893_s20   ;;  %s1566_s19 = sphi %s1623_s19, %s1892_s19   ;;  %s1562_s18 = sphi %s1621_s18, %s1891_s18   ;;  %s1558_s17 = sphi %s1619_s17, %s1890_s17   ;;  %s1554_s16 = sphi %s1617_s16, %s1889_s16   ;;  %s1550_s15 = sphi %s1615_s15, %s1888_s15  }
   0x8   : > { %p1657_p1 = scmp.eq.s32.totalorder %s1880_s23, 0  ;;  %p991_p2 = scmp.ge.s32.totalorder %s1578_s22, 1 }
   0x9   : > { %p130_p3 = scmp.lt.s32.totalorder %s1578_s22, 7  ;;  %s1580_s27 = smov [#allocation4]  }
   0xa   : > { %p1665_p4 = por %p1657_p1, %p72_p0  ;;  %s142_s28 = sshll.u32 %s1580_s27, 4  ;;  %s143_s28 = int_to_ptr.vmem [resolvable:$true] %s142_s28 }
   0xb   : > { %p1669_p5 = pnand %p991_p2, %p130_p3  ;;  %s1407_s29 = scalar_lea.vmem %s143_s28, 4096 }
   0xc   : > { %p1408_p9 = scmp.ne.s32.totalorder %s143_s28, %s1407_s29  ;;  %p1415_p12 = scmp.lt.s32.totalorder %s143_s28, %s143_s28 }
   0xd   : > { %p1262_p6 = pneg %p1669_p5  ;;  %p1416_p13 = scmp.lt.s32.totalorder %s1407_s29, %s1407_s29 }
   0xf   : > { %p1263_p7 = pnand %p1262_p6, %p1657_p1  ;;  %p1417_p0 = por %p1416_p13, %p1415_p12 }
  0x11   : > { %p1398_p8 = pneg %p1263_p7 }
  0x13   : > { %p1410_p10 = pnand %p1408_p9, %p1398_p8 }
  0x15   : > { %p1411_p11 = pneg %p1410_p10 }
  0x17   : > { %p1418_p2 = pnand %p1417_p0, %p1411_p11 }
  0x19   : > { %1421 = shalt.err (!%p1418_p2)
}
  0x1a   : > { %s1581_s30 = smov 128   ;;  %s1582_s5 = smov 8  }
  0x1b   : > { %1265 = dma.hbm_to_vmem [thread:$0]  (!%p1263_p7), %s1875_s0, 4096, %s143_s28, [#allocation5], %s1581_s30, %s1581_s30, %s1582_s5  }
  0x1c   : > { %s28_s8 = sadd.s32 1, %s1570_s20  ;;  %s31_s9 = sadd.s32 1, %s1574_s21 }
  0x1d   : > { %p29_p3 = scmp.ge.s32.totalorder %s28_s8, 2  ;;  %s59_s10 = sadd.s32 1, %s1558_s17 }
  0x1e   : > { %p66_p6 = scmp.ne.s32.totalorder %s1558_s17, %s1554_s16  ;;  %p67_p8 = scmp.eq.s32.totalorder %s1578_s22, 0 }
  0x1f   : > { %s1896_s8 = smov (%p29_p3, %s28_s8), 0  ;;  %s1898_s9 = smov (!%p29_p3, %s31_s9), %s1574_s21 }
  0x20   : > { %p1271_p9 = scmp.lt.s32.totalorder %s1578_s22, 6  ;;  %p33_p10 = scmp.ge.s32.totalorder %s1898_s9, 3 }
  0x21   : > { %s156_s11 = sand.u32 1, %s1558_s17   ;;  %p68_p11 = por %p67_p8, %p66_p6 }
  0x22   : > { %s1900_s9 = smov (%p33_p10, %s1898_s9), 0  ;;  %s994_s12 = sshll.u32 %s156_s11, 6 }
  0x23   : > { %s1072_s13 = sshll.u32 %s1574_s21, 10  ;;  %s56_s14 = ssub.s32 %s1574_s21, %s1900_s9 }
  0x24   : > { %p57_p7 = scmp.eq.s32.totalorder %s56_s14, 0  ;;  %s166_s28 = scalar_lea.hbm %s1877_s2, %s1072_s13 }
  0x25   : > { %s160_s29 = scalar_lea.vmem [#allocation7], %s994_s12  ;;  %p1699_p12 = pnand %p1271_p9, %p68_p11 }
  0x26   : > { %s167_s30 = sshll.u32 %s160_s29, 4  ;;  %s157_s7 = scalar_lea.sflag [#allocation8], %s156_s11  ;;  %s168_s30 = int_to_ptr.vmem [resolvable:$true] %s167_s30 }
  0x27   : > { %s1704_s6 = scalar_select %p57_p7, %s1558_s17, %s59_s10  }
  0x28   : > { %p1424_p13 = pneg %p1699_p12  ;;  %s1435_s23 = scalar_lea.vmem %s168_s30, 1024 }
  0x29   : > { %p1436_p0 = scmp.ne.s32.totalorder %s168_s30, %s1435_s23  ;;  %s1583_s14 = smov [#allocation7]  }
  0x2a   : > { %s1440_s15 = sshll.u32 %s1583_s14, 4  ;;  %s1441_s15 = int_to_ptr.vmem [resolvable:$false] %s1440_s15 }
  0x2b   : > { %p1438_p2 = pnand %p1436_p0, %p1424_p13  ;;  %s1442_s12 = scalar_lea.vmem %s1441_s15, 2048 }
  0x2c   : > { %p1443_p6 = scmp.lt.s32.totalorder %s168_s30, %s1441_s15  ;;  %p1444_p8 = scmp.lt.s32.totalorder %s1442_s12, %s1435_s23 }
  0x2d   : > { %p1439_p3 = pneg %p1438_p2 }
  0x2e   : > { %p1445_p9 = por %p1444_p8, %p1443_p6 }
  0x30   : > { %p1446_p10 = pnand %p1445_p9, %p1439_p3 }
  0x32   : > { %1449 = shalt.err (!%p1446_p10)
}
  0x33   : > { %s1584_s13 = smov 64   ;;  %s1585_s10 = smov 4  }
  0x34   : > { %1269 = dma.hbm_to_vmem [thread:$0]  (!%p1699_p12), %s166_s28, 1024, %s168_s30, %s157_s7, %s1584_s13, %s1584_s13, %s1585_s10  }
  0x35   : > { %185 = sbr.rel (%p1669_p5) target bundleno = 610 (0x262), region = 32 }
  0x3a   : > { %1533 = dma.done.wait (%p1657_p1), [#allocation5], 4096  }
  0x3b   : > { %1535 = vsyncadd (%p1657_p1), [#allocation5], 4294963200  ;;  %s191_s23 = sand.u32 1, %s1554_s16  }
  0x3c   : > { %s999_s11 = sshll.u32 %s191_s23, 6  ;;  %s192_s27 = scalar_lea.sflag [#allocation8], %s191_s23 }
  0x3d   : > { %s1717_s29 = scalar_lea.vmem [#allocation7], %s999_s11 }
  0x3e   : > { %1537 = dma.done.wait (%p1665_p4), %s192_s27, 1024  }
  0x3f   : > { %1539 = vsyncadd (%p1665_p4), %s192_s27, 4294966272  ;;  %p216_p1 = scmp.lt.s32.totalorder %s1566_s19, 2  ;;  %p220_p5 = scmp.lt.s32.totalorder %s1566_s19, 0 }
  0x40   : > { %s221_s24 = ssub.s32 0, %s1566_s19  ;;  %s1727_s26 = sshll.u32 %s1562_s18, 7 }
  0x41   : > { %s1730_s28 = scalar_select %p216_p1, %s1566_s19, 2 }
  0x42   : > { %s1000_s30 = smin.u32 %s1566_s19, %s221_s24  ;;  %p235_p11 = scmp.eq.s32.totalorder %s1566_s19, 0 }
  0x43   : > { %s218_s7 = scalar_lea.vmem %s1878_s3, %s1730_s28  ;;  %s223_s14 = sand.u32 1, %s1000_s30  }
  0x44   : > { %s224_s15 = ssub.s32 0, %s223_s14  ;;  %p236_p4 = scmp.eq.s32.totalorder %s1562_s18, 0 }
  0x45   : > { %s1902_s15 = smov (!%p220_p5, %s224_s15), %s223_s14  ;;  %s1586_s10 = smov [#allocation2]  }
  0x46   : > { %p1739_p7 = pnand %p236_p4, %p235_p11  ;;  %p1002_p12 = scmp.lt.s32.totalorder %s1902_s15, 0 }
  0x47   : > { %s230_s13 = sadd.s32 2, %s1902_s15  ;;  %s248_s23 = sshll.u32 %s1586_s10, 4  ;;  %s249_s23 = int_to_ptr.vmem [resolvable:$true] %s248_s23 }
  0x48   : > { %p1255_p13 = pneg %p1739_p7  ;;  %s1904_s13 = smov (!%p1002_p12, %s230_s13), %s1902_s15 }
  0x49   : > { %s1003_s11 = sshll.u32 %s1904_s13, 8  ;;  %s1461_s24 = scalar_lea.vmem %s249_s23, 2048 }
  0x4a   : > { %s1745_s27 = ssub.s32 256, %s1003_s11  ;;  %p1462_p0 = scmp.ne.s32.totalorder %s249_s23, %s1461_s24 }
  0x4b   : > { %s1468_s18 = scalar_lea.vmem %s249_s23, 4096  ;;  %p1469_p6 = scmp.lt.s32.totalorder %s249_s23, %s249_s23 }
  0x4c   : > { %p1464_p2 = pnand %p1462_p0, %p1255_p13  ;;  %p1470_p8 = scmp.lt.s32.totalorder %s1468_s18, %s1461_s24 }
  0x4e   : > { %p1465_p3 = pneg %p1464_p2  ;;  %p1471_p9 = por %p1470_p8, %p1469_p6 }
  0x50   : > { %p1472_p10 = pnand %p1471_p9, %p1465_p3 }
  0x52   : > { %1475 = shalt.err (!%p1472_p10)  }
  0x53   : > { %1256 = dma.hbm_to_vmem [thread:$0]  (!%p1739_p7), %s1876_s1, 2048, %s249_s23, [#allocation3] }
  0x54   : > { %1541 = dma.done.wait (%p1255_p13), [#allocation3], 2048 }
  0x55   : > { %1543 = vsyncadd (%p1255_p13), [#allocation3], 4294965248  ;;  %s277_s5 = sshra.s32 %s1003_s11, 3  ;;  %s1775_s12 = scalar_lea.vmem [#allocation4], %s1727_s26  ;;  %v1388_v17 = vld [vmem:[%s1717_s29 + $0x38] sm:$0xff]   ;;  %v1389_v19 = vld [vmem:[%s1717_s29 + $0x30] sm:$0xff]  }
  0x56   : > { %s1007_s14 = sshll.u32 %s277_s5, 2  ;;  %v1366_v11 = vld [vmem:[%s1775_s12 + $0x4] ss:$8 sps:$4 sm:$0xff]   ;;  %v1364_v18 = vld [vmem:[%s1775_s12] ss:$8 sps:$4 sm:$0xff]   ;;  %1217 = vmatprep.subr.bf16.mxu1 %v1388_v17  ;;  %v1392_v36 = vld [vmem:[%s1717_s29 + $0x18] sm:$0xff]  }
  0x57   : > { %s1761_s15 = scalar_lea.vmem [#allocation2], %s1007_s14  ;;  %521 = vmatprep.mubr.bf16.mxu0 %v1366_v11  ;;  %v1367_v20 = vld [vmem:[%s1775_s12 + $0x14] ss:$8 sps:$4 sm:$0xff]   ;;  %1218 = vmatpush3.bf16.msra.mxu1 %v1388_v17  ;;  %v1390_v21 = vld [vmem:[%s1717_s29 + $0x28] sm:$0xff]   ;;  %v1391_v22 = vld [vmem:[%s1717_s29 + $0x20] sm:$0xff]   ;;  %p1066_p1 = scmp.ne.s32.totalorder %s1566_s19, 2 }
  0x58   : > { %v1348_v0 = vld [vmem:[%s1761_s15 + $0x78] sm:$0xff]   ;;  %v1350_v2 = vld [vmem:[%s1761_s15 + $0x70] sm:$0xff]   ;;  %v1352_v4 = vld [vmem:[%s1761_s15 + $0x68] sm:$0xff]   ;;  %1219 = vmatprep.subr.bf16.mxu1 %v1389_v19 }
  0x59   : > { %v1349_v1 = vld [vmem:[%s1761_s15 + $0x38] sm:$0xff]   ;;  %1137 = vmatprep.subr.bf16.mxu0 %v1348_v0  ;;  %v1351_v3 = vld [vmem:[%s1761_s15 + $0x30] sm:$0xff]   ;;  %v1353_v5 = vld [vmem:[%s1761_s15 + $0x28] sm:$0xff]  }
  0x5a   : > { %1138 = vmatpush3.bf16.msra.mxu0 %v1349_v1  ;;  %v1354_v6 = vld [vmem:[%s1761_s15 + $0x60] sm:$0xff]   ;;  %v1356_v8 = vld [vmem:[%s1761_s15 + $0x58] sm:$0xff]   ;;  %v1358_v10 = vld [vmem:[%s1761_s15 + $0x50] sm:$0xff]  }
  0x5b   : > { %1139 = vmatprep.subr.bf16.mxu0 %v1350_v2  ;;  %v1355_v7 = vld [vmem:[%s1761_s15 + $0x20] sm:$0xff]   ;;  %v1357_v9 = vld [vmem:[%s1761_s15 + $0x18] sm:$0xff]   ;;  %v1359_v12 = vld [vmem:[%s1761_s15 + $0x10] sm:$0xff]   ;;  %1220 = vmatpush3.bf16.msra.mxu1 %v1389_v19 }
  0x5c   : > { %v1360_v13 = vld [vmem:[%s1761_s15 + $0x48] sm:$0xff]   ;;  %v1362_v15 = vld [vmem:[%s1761_s15 + $0x40] sm:$0xff]   ;;  %1221 = vmatprep.subr.bf16.mxu1 %v1390_v21  ;;  %v1369_v23 = vld [vmem:[%s1775_s12 + $0x10] ss:$8 sps:$4 sm:$0xff]  }
  0x5d   : > { %v1361_v14 = vld [vmem:[%s1761_s15 + $0x8] sm:$0xff]   ;;  %v1363_v16 = vld [vmem:[%s1761_s15] sm:$0xff]   ;;  %v1373_v26 = vld [vmem:[%s1775_s12 + $0x34] ss:$8 sps:$4 sm:$0xff]  }
  0x5e   : > { %1140 = vmatpush3.bf16.msra.mxu0 %v1351_v3  ;;  %v1370_v24 = vld [vmem:[%s1775_s12 + $0x24] ss:$8 sps:$4 sm:$0xff]   ;;  %v1372_v25 = vld [vmem:[%s1775_s12 + $0x20] ss:$8 sps:$4 sm:$0xff]   ;;  %v1375_v27 = vld [vmem:[%s1775_s12 + $0x30] ss:$8 sps:$4 sm:$0xff]  }
  0x5f   : > { %1141 = vmatprep.subr.bf16.mxu0 %v1352_v4  ;;  %1222 = vmatpush3.bf16.msra.mxu1 %v1390_v21  ;;  %v1376_v28 = vld [vmem:[%s1775_s12 + $0x44] ss:$8 sps:$4 sm:$0xff]   ;;  %v1378_v29 = vld [vmem:[%s1775_s12 + $0x40] ss:$8 sps:$4 sm:$0xff]   ;;  %v1379_v30 = vld [vmem:[%s1775_s12 + $0x54] ss:$8 sps:$4 sm:$0xff]  }
  0x60   : > { %1223 = vmatprep.subr.bf16.mxu1 %v1391_v22  ;;  %v1381_v31 = vld [vmem:[%s1775_s12 + $0x50] ss:$8 sps:$4 sm:$0xff]   ;;  %v1382_v32 = vld [vmem:[%s1775_s12 + $0x64] ss:$8 sps:$4 sm:$0xff]   ;;  %v1384_v33 = vld [vmem:[%s1775_s12 + $0x60] ss:$8 sps:$4 sm:$0xff]  }
  0x61   : > { %v1385_v34 = vld [vmem:[%s1775_s12 + $0x74] ss:$8 sps:$4 sm:$0xff]   ;;  %v1387_v35 = vld [vmem:[%s1775_s12 + $0x70] ss:$8 sps:$4 sm:$0xff]   ;;  %v1394_v38 = vld [vmem:[%s1717_s29 + $0x8] sm:$0xff]  }
  0x62   : > { %1142 = vmatpush3.bf16.msra.mxu0 %v1353_v5  ;;  %v1393_v37 = vld [vmem:[%s1717_s29 + $0x10] sm:$0xff]   ;;  %v1395_v39 = vld [vmem:[%s1717_s29] sm:$0xff]   ;;  %s786_s29 = sadd.s32 %s1727_s26, %s1745_s27 }
  0x63   : > { %1143 = vmatprep.subr.bf16.mxu0 %v1354_v6  ;;  %1224 = vmatpush3.bf16.msra.mxu1 %v1391_v22  ;;  %s843_s23 = sshra.s32 %s786_s29, 3 }
  0x64   : > { %1225 = vmatprep.subr.bf16.mxu1 %v1392_v36  ;;  %s1065_s11 = sshll.u32 %s843_s23, 2 }
  0x65   : > { %s1822_s28 = scalar_lea.vmem [#allocation2], %s1065_s11 }
  0x66   : > { %1144 = vmatpush3.bf16.msra.mxu0 %v1355_v7 }
  0x67   : > { %1145 = vmatprep.subr.bf16.mxu0 %v1356_v8  ;;  %1226 = vmatpush3.bf16.msra.mxu1 %v1392_v36 }
  0x68   : > { %1227 = vmatprep.subr.bf16.mxu1 %v1393_v37 }
  0x6a   : > { %1146 = vmatpush3.bf16.msra.mxu0 %v1357_v9 }
  0x6b   : > { %1147 = vmatprep.subr.bf16.mxu0 %v1358_v10  ;;  %1228 = vmatpush3.bf16.msra.mxu1 %v1393_v37 }
  0x6c   : > { %1229 = vmatprep.subr.bf16.mxu1 %v1394_v38 }
  0x6e   : > { %1148 = vmatpush3.bf16.msra.mxu0 %v1359_v12 }
  0x6f   : > { %1149 = vmatprep.subr.bf16.mxu0 %v1360_v13  ;;  %1230 = vmatpush3.bf16.msra.mxu1 %v1394_v38 }
  0x70   : > { %1231 = vmatprep.subr.bf16.mxu1 %v1395_v39 }
  0x72   : > { %1150 = vmatpush3.bf16.msra.mxu0 %v1361_v14 }
  0x73   : > { %1151 = vmatprep.subr.bf16.mxu0 %v1362_v15  ;;  %1232 = vmatpush3.bf16.msra.mxu1 %v1395_v39 }
  0x76   : > { %1152 = vmatpush3.bf16.msra.mxu0 %v1363_v16 }
  0x79   : > { %522 = vmatmul.mubr.bf16.vlgmr.msra.gmra.mxu0 %v1364_v18 }
  0x7a   : > { %529 = vmatprep.mubr.bf16.mxu0 %v1367_v20 }
  0x81   : > { %530 = vmatmul.mubr.bf16.gmra.mxu0 %v1369_v23 }
  0x82   : > { %537 = vmatprep.mubr.bf16.mxu0 %v1370_v24 }
  0x89   : > { %538 = vmatmul.mubr.bf16.gmra.mxu0 %v1372_v25 }
  0x8a   : > { %545 = vmatprep.mubr.bf16.mxu0 %v1373_v26 }
  0x91   : > { %546 = vmatmul.mubr.bf16.gmra.mxu0 %v1375_v27 }
  0x92   : > { %553 = vmatprep.mubr.bf16.mxu0 %v1376_v28 }
  0x99   : > { %554 = vmatmul.mubr.bf16.gmra.mxu0 %v1378_v29 }
  0x9a   : > { %561 = vmatprep.mubr.bf16.mxu0 %v1379_v30 }
  0xa1   : > { %562 = vmatmul.mubr.bf16.gmra.mxu0 %v1381_v31 }
  0xa2   : > { %569 = vmatprep.mubr.bf16.mxu0 %v1382_v32 }
  0xa9   : > { %570 = vmatmul.mubr.bf16.gmra.mxu0 %v1384_v33  ;;  %v1040_v33 = vld [vmem:[%s218_s7] ss:$0 sm:$0xff]  ;;  %s867_s7 = scalar_lea.vmem (!%p1066_p1), [#allocation9], %s1727_s26 }
  0xaa   : > { %577 = vmatprep.mubr.bf16.mxu0 %v1385_v34 }
  0xb1   : > { %578 = vmatmul.mubr.bf16.gmra.mxu0 %v1387_v35 }
 0x139   : > { %v1153_v40 = vpop.f32.mrf.mxu0 }
 0x13b   : > { %v1154_v41 = vpop.f32.mrf.mxu0 }
 0x13c   : > { %v1155_v44 = vadd.f32 %v1154_v41, %v1153_v40 }
 0x13d   : > { %v1156_v42 = vpop.f32.mrf.mxu0 }
 0x13f   : > { %v1157_v43 = vpop.f32.mrf.mxu0 }
 0x140   : > { %v1158_v45 = vadd.f32 %v1157_v43, %v1156_v42 }
 0x141   : > { %v1159_v46 = vpop.f32.mrf.mxu0 }
 0x142   : > { %v602_v47 = vpack.c.bf16 %v1158_v45, %v1155_v44 }
 0x143   : > { %v1160_v48 = vpop.f32.mrf.mxu0 }
 0x144   : > { %1233 = vmatprep.mubr.bf16.mxu1 %v602_v47  ;;  %v1161_v51 = vadd.f32 %v1160_v48, %v1159_v46 }
 0x145   : > { %v1162_v49 = vpop.f32.mrf.mxu0 }
 0x147   : > { %v1163_v50 = vpop.f32.mrf.mxu0 }
 0x148   : > { %v1164_v52 = vadd.f32 %v1163_v50, %v1162_v49 }
 0x149   : > { %v1165_v53 = vpop.f32.mrf.mxu0 }
 0x14a   : > { %v603_v54 = vpack.c.bf16 %v1164_v52, %v1161_v51 }
 0x14b   : > { %v1166_v55 = vpop.f32.mrf.mxu0 }
 0x14c   : > { %1234 = vmatmul.mubr.bf16.vlgmr.msra.gmra.mxu1 %v603_v54  ;;  %v1167_v58 = vadd.f32 %v1166_v55, %v1165_v53 }
 0x14d   : > { %v1168_v56 = vpop.f32.mrf.mxu0 }
 0x14f   : > { %v1169_v57 = vpop.f32.mrf.mxu0 }
 0x150   : > { %v1170_v59 = vadd.f32 %v1169_v57, %v1168_v56 }
 0x151   : > { %v1171_v60 = vpop.f32.mrf.mxu0 }
 0x152   : > { %v604_v61 = vpack.c.bf16 %v1170_v59, %v1167_v58 }
 0x153   : > { %v1172_v62 = vpop.f32.mrf.mxu0 }
 0x154   : > { %1237 = vmatprep.mubr.bf16.mxu1 %v604_v61  ;;  %v1173_v1 = vadd.f32 %v1172_v62, %v1171_v60 }
 0x155   : > { %v1174_v63 = vpop.f32.mrf.mxu0 }
 0x157   : > { %v1175_v0 = vpop.f32.mrf.mxu0 }
 0x158   : > { %v1176_v2 = vadd.f32 %v1175_v0, %v1174_v63 }
 0x159   : > { %v1177_v3 = vpop.f32.mrf.mxu0 }
 0x15a   : > { %v605_v4 = vpack.c.bf16 %v1176_v2, %v1173_v1 }
 0x15b   : > { %v1178_v5 = vpop.f32.mrf.mxu0 }
 0x15c   : > { %1238 = vmatmul.mubr.bf16.gmra.mxu1 %v605_v4  ;;  %v1179_v8 = vadd.f32 %v1178_v5, %v1177_v3 }
 0x15d   : > { %v1180_v6 = vpop.f32.mrf.mxu0 }
 0x15f   : > { %v1181_v7 = vpop.f32.mrf.mxu0 }
 0x160   : > { %v1182_v9 = vadd.f32 %v1181_v7, %v1180_v6 }
 0x161   : > { %v1183_v10 = vpop.f32.mrf.mxu0 }
 0x162   : > { %v606_v11 = vpack.c.bf16 %v1182_v9, %v1179_v8 }
 0x163   : > { %v1184_v12 = vpop.f32.mrf.mxu0 }
 0x164   : > { %1241 = vmatprep.mubr.bf16.mxu1 %v606_v11  ;;  %v1185_v15 = vadd.f32 %v1184_v12, %v1183_v10 }
 0x165   : > { %v1186_v13 = vpop.f32.mrf.mxu0 }
 0x167   : > { %v1187_v14 = vpop.f32.mrf.mxu0 }
 0x168   : > { %v1188_v16 = vadd.f32 %v1187_v14, %v1186_v13 }
 0x169   : > { %v1189_v17 = vpop.f32.mrf.mxu0 }
 0x16a   : > { %v607_v18 = vpack.c.bf16 %v1188_v16, %v1185_v15 }
 0x16b   : > { %v1190_v19 = vpop.f32.mrf.mxu0 }
 0x16c   : > { %1242 = vmatmul.mubr.bf16.gmra.mxu1 %v607_v18  ;;  %v1191_v22 = vadd.f32 %v1190_v19, %v1189_v17 }
 0x16d   : > { %v1192_v20 = vpop.f32.mrf.mxu0 }
 0x16f   : > { %v1193_v21 = vpop.f32.mrf.mxu0 }
 0x170   : > { %v1194_v23 = vadd.f32 %v1193_v21, %v1192_v20 }
 0x171   : > { %v1195_v24 = vpop.f32.mrf.mxu0 }
 0x172   : > { %v608_v25 = vpack.c.bf16 %v1194_v23, %v1191_v22 }
 0x173   : > { %v1196_v26 = vpop.f32.mrf.mxu0 }
 0x174   : > { %1245 = vmatprep.mubr.bf16.mxu1 %v608_v25  ;;  %v1197_v29 = vadd.f32 %v1196_v26, %v1195_v24 }
 0x175   : > { %v1198_v27 = vpop.f32.mrf.mxu0 }
 0x177   : > { %v1199_v28 = vpop.f32.mrf.mxu0 }
 0x178   : > { %v1200_v30 = vadd.f32 %v1199_v28, %v1198_v27 }
 0x17a   : > { %v609_v31 = vpack.c.bf16 %v1200_v30, %v1197_v29 }
 0x17c   : > { %1246 = vmatmul.mubr.bf16.gmra.mxu1 %v609_v31 }
 0x20c   : > { %v1235_v32 = vpop.f32.mrf.mxu1 }
 0x20d   : > { %v1813_v35 = vadd.f32 %v1235_v32, %v1040_v33 }
 0x20e   : > { %v699_v34 = vpop.f32.mrf.mxu1 }
 0x20f   : > { %v1815_v37 = vadd.f32 %v1040_v33, %v699_v34  ;;  %v764_v40 = vmax.f32 %v1813_v35, 0.0 }
 0x210   : > { %v1236_v36 = vpop.f32.mrf.mxu1 }
 0x211   : > { %v1817_v38 = vadd.f32 %v1236_v36, %v1040_v33  ;;  %v762_v43 = vmax.f32 %v1815_v37, 0.0 }
 0x212   : > { %v702_v39 = vpop.f32.mrf.mxu1 }
 0x213   : > { %v765_v41 = vmax.f32 %v1817_v38, 0.0  ;;  %v703_v42 = vadd.f32 %v1040_v33, %v702_v39 }
 0x215   : > { %v1098_v44 = vpack.c.bf16 %v765_v41, %v764_v40  ;;  %v763_v45 = vmax.f32 %v703_v42, 0.0 }
 0x217   : > { %1130 = vst [vmem:[%s1822_s28 + $0x8] sm:$0xff] %v1098_v44   ;;  %v1093_v46 = vpack.c.bf16 %v763_v45, %v762_v43 }
 0x219   : > { %1094 = vst [vmem:[%s1822_s28] sm:$0xff] %v1093_v46  }
 0x21c   : > { %v1239_v47 = vpop.f32.mrf.mxu1 }
 0x21d   : > { %v724_v49 = vadd.f32 %v1239_v47, %v1040_v33 }
 0x21e   : > { %v715_v48 = vpop.f32.mrf.mxu1 }
 0x21f   : > { %v716_v51 = vadd.f32 %v1040_v33, %v715_v48  ;;  %v768_v54 = vmax.f32 %v724_v49, 0.0 }
 0x220   : > { %v1240_v50 = vpop.f32.mrf.mxu1 }
 0x221   : > { %v727_v52 = vadd.f32 %v1240_v50, %v1040_v33  ;;  %v766_v57 = vmax.f32 %v716_v51, 0.0 }
 0x222   : > { %v718_v53 = vpop.f32.mrf.mxu1 }
 0x223   : > { %v769_v55 = vmax.f32 %v727_v52, 0.0  ;;  %v719_v56 = vadd.f32 %v1040_v33, %v718_v53 }
 0x225   : > { %v1108_v58 = vpack.c.bf16 %v769_v55, %v768_v54  ;;  %v767_v59 = vmax.f32 %v719_v56, 0.0 }
 0x227   : > { %1132 = vst [vmem:[%s1822_s28 + $0x18] sm:$0xff] %v1108_v58   ;;  %v1103_v60 = vpack.c.bf16 %v767_v59, %v766_v57 }
 0x229   : > { %1131 = vst [vmem:[%s1822_s28 + $0x10] sm:$0xff] %v1103_v60  }
 0x22c   : > { %v1243_v61 = vpop.f32.mrf.mxu1 }
 0x22d   : > { %v740_v63 = vadd.f32 %v1243_v61, %v1040_v33 }
 0x22e   : > { %v731_v62 = vpop.f32.mrf.mxu1 }
 0x22f   : > { %v732_v1 = vadd.f32 %v1040_v33, %v731_v62  ;;  %v772_v4 = vmax.f32 %v740_v63, 0.0 }
 0x230   : > { %v1244_v0 = vpop.f32.mrf.mxu1 }
 0x231   : > { %v743_v2 = vadd.f32 %v1244_v0, %v1040_v33  ;;  %v770_v7 = vmax.f32 %v732_v1, 0.0 }
 0x232   : > { %v734_v3 = vpop.f32.mrf.mxu1 }
 0x233   : > { %v773_v5 = vmax.f32 %v743_v2, 0.0  ;;  %v735_v6 = vadd.f32 %v1040_v33, %v734_v3 }
 0x235   : > { %v1118_v8 = vpack.c.bf16 %v773_v5, %v772_v4  ;;  %v771_v9 = vmax.f32 %v735_v6, 0.0 }
 0x237   : > { %1134 = vst [vmem:[%s1822_s28 + $0x28] sm:$0xff] %v1118_v8   ;;  %v1113_v10 = vpack.c.bf16 %v771_v9, %v770_v7 }
 0x239   : > { %1133 = vst [vmem:[%s1822_s28 + $0x20] sm:$0xff] %v1113_v10  }
 0x23c   : > { %v1247_v11 = vpop.f32.mrf.mxu1 }
 0x23d   : > { %v756_v13 = vadd.f32 %v1247_v11, %v1040_v33 }
 0x23e   : > { %v747_v12 = vpop.f32.mrf.mxu1 }
 0x23f   : > { %v748_v15 = vadd.f32 %v1040_v33, %v747_v12  ;;  %v776_v18 = vmax.f32 %v756_v13, 0.0 }
 0x240   : > { %v1248_v14 = vpop.f32.mrf.mxu1 }
 0x241   : > { %v759_v16 = vadd.f32 %v1248_v14, %v1040_v33  ;;  %v774_v21 = vmax.f32 %v748_v15, 0.0 }
 0x242   : > { %v750_v17 = vpop.f32.mrf.mxu1 }
 0x243   : > { %v777_v19 = vmax.f32 %v759_v16, 0.0  ;;  %v751_v20 = vadd.f32 %v1040_v33, %v750_v17 }
 0x245   : > { %v1128_v22 = vpack.c.bf16 %v777_v19, %v776_v18  ;;  %v775_v23 = vmax.f32 %v751_v20, 0.0  ;;  %866 = sbr.rel (%p1066_p1) target bundleno = 594 (0x252), region = 52 }
 0x247   : > { %1136 = vst [vmem:[%s1822_s28 + $0x38] sm:$0xff] %v1128_v22   ;;  %v1123_v24 = vpack.c.bf16 %v775_v23, %v774_v21 }
 0x249   : > { %1135 = vst [vmem:[%s1822_s28 + $0x30] sm:$0xff] %v1123_v24  }
 0x24a   : > { %868 = vst [vmem:[%s867_s7] sm:$0xff] %v762_v43  ;;  %869 = vst [vmem:[%s867_s7 + $0x8] sm:$0xff] %v763_v45 }
 0x24b   : > { %870 = vst [vmem:[%s867_s7 + $0x10] sm:$0xff] %v764_v40  ;;  %871 = vst [vmem:[%s867_s7 + $0x18] sm:$0xff] %v765_v41 }
 0x24c   : > { %872 = vst [vmem:[%s867_s7 + $0x20] sm:$0xff] %v766_v57  ;;  %873 = vst [vmem:[%s867_s7 + $0x28] sm:$0xff] %v767_v59 }
 0x24d   : > { %874 = vst [vmem:[%s867_s7 + $0x30] sm:$0xff] %v768_v54  ;;  %875 = vst [vmem:[%s867_s7 + $0x38] sm:$0xff] %v769_v55 }
 0x24e   : > { %876 = vst [vmem:[%s867_s7 + $0x40] sm:$0xff] %v770_v7  ;;  %877 = vst [vmem:[%s867_s7 + $0x48] sm:$0xff] %v771_v9 }
 0x24f   : > { %878 = vst [vmem:[%s867_s7 + $0x50] sm:$0xff] %v772_v4  ;;  %879 = vst [vmem:[%s867_s7 + $0x58] sm:$0xff] %v773_v5 }
 0x250   : > { %880 = vst [vmem:[%s867_s7 + $0x60] sm:$0xff] %v774_v21  ;;  %881 = vst [vmem:[%s867_s7 + $0x68] sm:$0xff] %v775_v23 }
 0x251   : > { %882 = vst [vmem:[%s867_s7 + $0x70] sm:$0xff] %v776_v18  ;;  %883 = vst [vmem:[%s867_s7 + $0x78] sm:$0xff] %v777_v19 }
 0x252 PF: > { %s1886_s19 = sadd.s32 4294967295, %s1578_s22   ;;  %s1587_s27 = smov [#allocation9]  }
 0x253   : > { %p1836_p5 = scmp.eq.s32.totalorder %s1886_s19, 5  ;;  %s890_s24 = sshll.u32 %s1587_s27, 4  ;;  %s891_s24 = int_to_ptr.vmem [resolvable:$true] %s890_s24 }
 0x254   : > { %s1476_s18 = scalar_lea.vmem %s891_s24, 4096  ;;  %p1483_p12 = scmp.lt.s32.totalorder %s891_s24, %s891_s24 }
 0x255   : > { %p1477_p11 = scmp.ne.s32.totalorder %s891_s24, %s1476_s18  ;;  %p1484_p13 = scmp.lt.s32.totalorder %s1476_s18, %s1476_s18 }
 0x257   : > { %p1478_p4 = pnand %p1477_p11, %p1836_p5  ;;  %p1485_p0 = por %p1484_p13, %p1483_p12 }
 0x259   : > { %p1479_p7 = pneg %p1478_p4 }
 0x25b   : > { %p1486_p2 = pnand %p1485_p0, %p1479_p7 }
 0x25d   : > { %1489 = shalt.err (!%p1486_p2)
}
 0x25e   : > { %s1588_s30 = smov 128   ;;  %s1589_s25 = smov 8  }
 0x25f   : > { %1259 = dma.vmem_to_hbm [thread:$0]  (%p1836_p5), %s891_s24, 4096, %s1879_s4, [#allocation6], %s1588_s30, %s1588_s30, %s1589_s25  }
 0x260   : > { %1545 = dma.done.wait (%p1836_p5), [#allocation6], 4096  }
 0x261   : > { %1547 = vsyncadd (%p1836_p5), [#allocation6], 4294963200 }
 0x262 PF: > { %s19_s22 = sadd.s32 1, %s1578_s22   ;;  %s1888_s15 = smov %s1554_s16 }
 0x263   : > { %p16_p3 = scmp.ge.s32.totalorder %s19_s22, 8   ;;  %s1889_s16 = smov %s1558_s17 }
 0x264   : > { %s1890_s17 = smov %s1704_s6  ;;  %s1891_s18 = smov %s1570_s20 }
 0x265   : > { %s1892_s19 = smov %s1574_s21  ;;  %s1893_s20 = smov %s1896_s8 }
 0x266   : > { %s1894_s21 = smov %s1900_s9  ;;  %18 = sbr.rel (!%p16_p3) target bundleno = 7 (0x7), region = 93 }
 0x26b   :  { %906 = vsyncpa [#allocation5], 1 }
 0x26c   :  { %908 = vsyncpa [#allocation5 + $0x1], 1 }
 0x26d   :  { %909 = vsyncpa [#allocation8], 1 }
 0x26e   :  { %911 = vsyncpa [#allocation8 + $0x1], 1 }
 0x26f   :  { %912 = vsyncpa [#allocation6], 1 }
 0x270   :  { %914 = vsyncpa [#allocation6 + $0x1], 1 }
 0x271   :  { %915 = vsyncmov [#allocation3] }
 0x274   :  { %s916_s12 = vpop.sfrf %915 }
 0x275   :  { %p1071_p6 = scmp.ne.s32.totalorder %s916_s12, 0 }
 0x277   :  { %920 = shalt.err (%p1071_p6)  }

</bundles_post_ra>
